<compile_context>
chip_gen: v7x
topology: tpu7x:2x2x1
jax: 0.10.0
libtpu: 0.0.40
codegen_flags: <defaults>
</compile_context>

<pallas_src>
import jax
import jax.numpy as jnp
import numpy as np
from jax.experimental import pallas as pl
from jax.experimental.pallas import tpu as pltpu


# ----------------------------------------------------------------------------
# Generation-dependent knobs.
# ----------------------------------------------------------------------------
def _tpu_vmem_capacity_bytes():
    try:
        info = pltpu.get_tpu_info()
        cap = getattr(info, "vmem_capacity_bytes", None)
        if cap:
            return int(cap)
    except Exception:
        pass
    return 64 * 1024 * 1024                      # conservative (v7x per-core)


_VMEM_CAP = _tpu_vmem_capacity_bytes()
_BIG_VMEM = _VMEM_CAP >= (100 << 20)             # v5e / v6e (128 MiB)
_VMEM_LIMIT = (100 << 20) if _BIG_VMEM else (48 << 20)
_MAX_TH = 64 if _BIG_VMEM else 32


def _pick_row_tile(H, max_th):
    # Row tile is the second-minor dim of the lane-dense output block, so it
    # must be a multiple of 8 (or equal H).  Prefer >= 2 tiles per image.
    if H % 8 == 0:
        for th in (64, 32, 16, 8):
            if th <= max_th and th < H and H % th == 0:
                return th
    return H


# ----------------------------------------------------------------------------
# Kernel A: fused 3x3 / stride-s / pad-1 max pool (no channel replication),
# row-tiled.  Input is passed pre-reshaped (free, contiguous) to
# (B, Ho, s, Wo, s*C) so element (h, j, w, k*C + c) == x[s*h + j, s*w + k, c];
# the strided window gather becomes static phase slices + 1-step shifts with
# -inf edges.  Output is written lane-dense as (B, Ho, Wo*C).
# ----------------------------------------------------------------------------
def maxpool3x3_stride_s(x_nhwc, s, out_dtype=None):
    B, Hi, Wi, C = x_nhwc.shape
    assert s >= 2, "FeedforwardBlock pooling stride is always >= 2"
    # PyTorch MaxPool2d(3, stride=s, padding=1) output equals Hi//s only when
    # Hi, Wi are divisible by s (true for this pyramid); assert instead of
    # silently diverging.
    assert Hi % s == 0 and Wi % s == 0, "spatial size must be divisible by s"
    Ho, Wo = Hi // s, Wi // s
    out_dtype = x_nhwc.dtype if out_dtype is None else out_dtype
    xr = x_nhwc.reshape(B, Ho, s, Wo, s * C)      # free contiguous reshape

    THo = _pick_row_tile(Ho, _MAX_TH)
    n_to = Ho // THo

    def kernel(x_ref, h_ref, o_ref):
        t = pl.program_id(1)
        x = x_ref[...]                            # (THo, s, Wo, s*C)

        def colmax(p):                            # (R, Wo, s*C) -> (R, Wo, C)
            # window columns {s*w-1, s*w, s*w+1}; s*w-1 lives in col block w-1
            c0 = p[:, :, 0:C]
            c1 = p[:, :, C:2 * C]
            cm = jnp.maximum(c0, c1)
            cl = p[:, :, (s - 1) * C:s * C]
            left = jnp.full((p.shape[0], 1, C), -jnp.inf, p.dtype)
            if Wo > 1:
                cl = jnp.concatenate([left, cl[:, :Wo - 1, :]], axis=1)
            else:
                cl = left
            return jnp.maximum(cm, cl)

        cm0 = colmax(x[:, 0])                     # rows s*h
        cm1 = colmax(x[:, 1])                     # rows s*h + 1
        cml = cm1 if s == 2 else colmax(x[:, s - 1])   # rows s*h + s-1

        # row s*h - 1 == previous row-block at phase s-1; for local row 0 it
        # comes from the 1-row halo block (-inf at the image top).
        hm = colmax(h_ref[0])                     # (1, Wo, C)
        hm = jnp.where(t == 0, jnp.full_like(hm, -jnp.inf), hm)
        if THo > 1:
            up = jnp.concatenate([hm, cml[:THo - 1]], axis=0)
        else:
            up = hm

        res = jnp.maximum(jnp.maximum(cm0, cm1), up)        # (THo, Wo, C)
        o_ref[...] = res.reshape(THo, Wo * C).astype(o_ref.dtype)

    out = pl.pallas_call(
        kernel,
        out_shape=jax.ShapeDtypeStruct((B, Ho, Wo * C), out_dtype),
        grid=(B, n_to),
        in_specs=[
            pl.BlockSpec((None, THo, s, Wo, s * C),
                         lambda b, t: (b, t, 0, 0, 0)),
            # 1-row halo: last row of the previous tile at phase s-1 (clamped
            # at the top; replaced by -inf in-kernel for t == 0).
            pl.BlockSpec((None, 1, 1, Wo, s * C),
                         lambda b, t: (b, jnp.maximum(t * THo - 1, 0),
                                       s - 1, 0, 0)),
        ],
        out_specs=pl.BlockSpec((None, THo, Wo * C), lambda b, t: (b, t, 0)),
        compiler_params=pltpu.CompilerParams(
            dimension_semantics=("parallel", "parallel"),
            vmem_limit_bytes=_VMEM_LIMIT),
    )(xr, xr)
    return out.reshape(B, Ho, Wo, C)              # free metadata reshape


# ----------------------------------------------------------------------------
# Kernel B: fused branch sum (with in-kernel channel replication) + 3x3 conv
# as 9 accumulating per-tap MXU matmuls + folded bias + ReLU.
# Grid = (batch, row-tiles); all padding fused via halo loads in VMEM; output
# written as a lane-dense (TH, W*ni) slab.
# ----------------------------------------------------------------------------
def fused_sum_conv3x3_relu(addends, w_mat, b_row, mm_dtype):
    B, H, W, ni = addends[0].shape
    chans = [int(a.shape[-1]) for a in addends]
    for a in addends:
        assert a.shape[0] == B and a.shape[1] == H and a.shape[2] == W
        assert ni % a.shape[-1] == 0
    assert w_mat.shape == (9 * ni, ni)
    nin = len(addends)
    TH = _pick_row_tile(H, _MAX_TH)
    n_t = H // TH
    out_dtype = addends[0].dtype

    def kernel(*refs):
        x_refs = refs[:nin]
        w_ref = refs[nin]
        b_ref = refs[nin + 1]
        o_ref = refs[nin + 2]

        t = pl.program_id(1)
        row0 = pl.multiple_of(t * TH, TH)

        def load_rows(ref):
            # rows [row0-1, row0+TH]; out-of-image halo rows are zeroed here
            # (fused conv zero padding in H).
            above = ref[pl.ds(jnp.maximum(row0 - 1, 0), 1), :, :]
            above = above.astype(jnp.float32)
            above = jnp.where(t == 0, jnp.zeros_like(above), above)
            mid = ref[pl.ds(row0, TH), :, :].astype(jnp.float32)
            below = ref[pl.ds(jnp.minimum(row0 + TH, H - 1), 1), :, :]
            below = below.astype(jnp.float32)
            below = jnp.where(t == n_t - 1, jnp.zeros_like(below), below)
            return jnp.concatenate([above, mid, below], axis=0)

        # Branch sum with the channel replication fused in (lane concat);
        # accumulate in f32 (also correct for bf16 inputs).
        xs = None
        for r, c in zip(x_refs, chans):
            chunk = load_rows(r)                   # (TH+2, W, c) f32
            rep = ni // c
            if rep > 1:
                chunk = jnp.concatenate([chunk] * rep, axis=-1)
            xs = chunk if xs is None else xs + chunk

        # Fused zero padding in W (VMEM only), then drop to the MXU operand
        # dtype so the live buffer during the tap matmuls is halved for bf16.
        zc = jnp.zeros((TH + 2, 1, ni), jnp.float32)
        xs = jnp.concatenate([zc, xs, zc], axis=1)            # (TH+2, W+2, ni)
        xs = xs.astype(mm_dtype)

        # 3x3 conv as 9 accumulating matmuls (no 9x-wide im2col buffer).
        acc = jnp.zeros((TH * W, ni), jnp.float32)
        for dy in range(3):
            for dx in range(3):
                k = dy * 3 + dx
                tap = xs[dy:dy + TH, dx:dx + W, :].reshape(TH * W, ni)
                acc = acc + jnp.dot(tap, w_ref[k * ni:(k + 1) * ni, :],
                                    preferred_element_type=jnp.float32)

        y = jnp.maximum(acc + b_ref[...], 0.0)                 # (TH*W, ni)
        # Lane-dense store: (TH, W*ni) slab avoids masked sub-128 stores.
        o_ref[...] = y.reshape(TH, W * ni).astype(o_ref.dtype)

    in_specs = (
        [pl.BlockSpec((None, H, W, c), lambda b, t: (b, 0, 0, 0))
         for c in chans]
        + [pl.BlockSpec((9 * ni, ni), lambda b, t: (0, 0)),
           pl.BlockSpec((1, ni), lambda b, t: (0, 0))])

    out = pl.pallas_call(
        kernel,
        out_shape=jax.ShapeDtypeStruct((B, H, W * ni), out_dtype),
        grid=(B, n_t),
        in_specs=in_specs,
        out_specs=pl.BlockSpec((None, TH, W * ni), lambda b, t: (b, t, 0)),
        compiler_params=pltpu.CompilerParams(
            dimension_semantics=("parallel", "parallel"),
            vmem_limit_bytes=_VMEM_LIMIT),
    )(*addends, w_mat, b_row)
    return out.reshape(B, H, W, ni)               # free metadata reshape


# ----------------------------------------------------------------------------
# FeedforwardBlock forward (wrapper = layout/param glue only).
# ----------------------------------------------------------------------------
def feedforward_block(inp_nchw, w_hwio, bias, gamma, beta, rmean, rvar,
                      eps=1e-5, mm_dtype=None):
    n = len(inp_nchw) - 1
    inp = [jnp.transpose(x, (0, 2, 3, 1)) for x in inp_nchw]   # NCHW -> NHWC
    B, H, W, ni = inp[n].shape

    mmdt = jnp.float32 if mm_dtype is None else mm_dtype
    use_bf16 = np.dtype(mmdt) == np.dtype(jnp.bfloat16)
    # bf16 A->B intermediates only on the bf16 path (f32 path stays bitwise
    # close to the f32 reference).
    pool_dtype = jnp.bfloat16 if use_bf16 else inp[n].dtype

    # Pooled pyramid branches (Kernel A), un-replicated channels.
    addends = [inp[n]]
    for i in reversed(range(n)):
        s = 2 ** (n - i)
        pooled = maxpool3x3_stride_s(inp[i], s, out_dtype=pool_dtype)
        assert pooled.shape[1:3] == (H, W)
        addends.append(pooled)

    # Fold eval-mode BatchNorm into the conv weight / bias.
    scale = gamma / jnp.sqrt(rvar + eps)
    w_f = w_hwio * scale[None, None, None, :]
    b_f = (bias - rmean) * scale + beta

    w_mat = w_f.reshape(9 * ni, ni).astype(mmdt)    # tap-major weight rows
    b_row = b_f.reshape(1, ni).astype(jnp.float32)

    out = fused_sum_conv3x3_relu(addends, w_mat, b_row, mmdt)  # Kernel B
    return jnp.transpose(out, (0, 3, 1, 2))                    # NHWC -> NCHW


# ----------------------------------------------------------------------------
# Pure-JAX reference (for verification).
# ----------------------------------------------------------------------------
def reference(inp_nchw, w_hwio, bias, gamma, beta, rmean, rvar, eps=1e-5):
    n = len(inp_nchw) - 1
    inp = [jnp.transpose(x, (0, 2, 3, 1)) for x in inp_nchw]
    out = inp[n]
    for i in reversed(range(n)):
        s = 2 ** (n - i)
        x = jnp.concatenate([inp[i]] * s, axis=-1)
        x = jax.lax.reduce_window(x, -jnp.inf, jax.lax.max,
                                  (1, 3, 3, 1), (1, s, s, 1),
                                  ((0, 0), (1, 1), (1, 1), (0, 0)))
        out = out + x
    y = jax.lax.conv_general_dilated(
        out, w_hwio, (1, 1), ((1, 1), (1, 1)),
        dimension_numbers=('NHWC', 'HWIO', 'NHWC'))
    y = y + bias
    y = (y - rmean) / jnp.sqrt(rvar + eps) * gamma + beta
    y = jnp.maximum(y, 0.0)
    return jnp.transpose(y, (0, 3, 1, 2))


if __name__ == "__main__":
    n = 2      # number of pooling levels
    ni = 8     # channels of the finest (output) feature map
    B = 2
    Hn = 8     # spatial size of inp[n]

    key = jax.random.PRNGKey(0)

    # inp[i] has ni / 2**(n-i) channels and Hn * 2**(n-i) spatial size (NCHW).
    inp = []
    for i in range(n + 1):
        f = 2 ** (n - i)
        key, k = jax.random.split(key)
        inp.append(jax.random.normal(k, (B, ni // f, Hn * f, Hn * f),
                                     jnp.float32))

    key, kw, kb, kg, kbt, km, kv = jax.random.split(key, 7)
    w_hwio = 0.1 * jax.random.normal(kw, (3, 3, ni, ni), jnp.float32)
    bias = 0.1 * jax.random.normal(kb, (ni,), jnp.float32)
    gamma = 1.0 + 0.1 * jax.random.normal(kg, (ni,), jnp.float32)
    beta = 0.1 * jax.random.normal(kbt, (ni,), jnp.float32)
    rmean = 0.1 * jax.random.normal(km, (ni,), jnp.float32)
    rvar = 0.5 + jnp.abs(jax.random.normal(kv, (ni,), jnp.float32))

    ref = jax.block_until_ready(
        reference(inp, w_hwio, bias, gamma, beta, rmean, rvar))

    # f32 MXU operands + f32 intermediates: must match the f32 reference.
    out = jax.block_until_ready(
        feedforward_block(inp, w_hwio, bias, gamma, beta, rmean, rvar))
    np.testing.assert_allclose(np.asarray(out), np.asarray(ref),
                               rtol=1e-3, atol=1e-3)

    # bf16 MXU operands + bf16 pooled intermediates with f32 accumulation
    # (recommended on all TPU generations); tolerance covers bf16 operand /
    # intermediate rounding only.
    out_bf16 = jax.block_until_ready(
        feedforward_block(inp, w_hwio, bias, gamma, beta, rmean, rvar,
                          mm_dtype=jnp.bfloat16))
    np.testing.assert_allclose(np.asarray(out_bf16), np.asarray(ref),
                               rtol=5e-2, atol=1e-1)

    print("KERNEL_OK")
</pallas_src>

<mosaic_0001>
module attributes {stable_mosaic.version = 11 : i64} {
  func.func @kernel(%arg0: i32, %arg1: i32, %arg2: memref<1x8x2x8x8xf32, #tpu.memory_space<vmem>>, %arg3: memref<1x1x1x8x8xf32, #tpu.memory_space<vmem>>, %arg4: memref<1x8x32xf32, #tpu.memory_space<vmem>>) attributes {dimension_semantics = [#tpu.dimension_semantics<parallel>, #tpu.dimension_semantics<parallel>], iteration_bounds = array<i64: 2, 1>, scalar_prefetch = 0 : i64, scratch_operands = 0 : i64, tpu.core_type = #tpu.core_type<tc>, window_params = [{transform_indices = @transform_0, window_bounds = array<i64: 1, 8, 2, 8, 8>}, {transform_indices = @transform_1, window_bounds = array<i64: 1, 1, 1, 8, 8>}, {transform_indices = @transform_2, window_bounds = array<i64: 1, 8, 32>}]} {
    %c0 = arith.constant 0 : index
    %c0_0 = arith.constant 0 : index
    %c0_1 = arith.constant 0 : index
    %c0_2 = arith.constant 0 : index
    %c0_3 = arith.constant 0 : index
    %0 = vector.load %arg2[%c0, %c0_0, %c0_1, %c0_2, %c0_3] : memref<1x8x2x8x8xf32, #tpu.memory_space<vmem>>, vector<1x8x2x8x8xf32>
    %1 = vector.shape_cast %0 : vector<1x8x2x8x8xf32> to vector<8x2x8x8xf32>
    %2 = vector.extract_strided_slice %1 {offsets = [0, 0, 0, 0], sizes = [8, 1, 8, 8], strides = [1, 1, 1, 1]} : vector<8x2x8x8xf32> to vector<8x1x8x8xf32>
    %3 = vector.shape_cast %2 : vector<8x1x8x8xf32> to vector<8x8x8xf32>
    %4 = vector.extract_strided_slice %3 {offsets = [0, 0, 0], sizes = [8, 8, 4], strides = [1, 1, 1]} : vector<8x8x8xf32> to vector<8x8x4xf32>
    %5 = vector.extract_strided_slice %3 {offsets = [0, 0, 4], sizes = [8, 8, 4], strides = [1, 1, 1]} : vector<8x8x8xf32> to vector<8x8x4xf32>
    %6 = arith.maximumf %4, %5 : vector<8x8x4xf32>
    %7 = vector.extract_strided_slice %3 {offsets = [0, 0, 4], sizes = [8, 8, 4], strides = [1, 1, 1]} : vector<8x8x8xf32> to vector<8x8x4xf32>
    %cst = arith.constant 0xFF800000 : f32
    %8 = vector.broadcast %cst : f32 to vector<8x1x4xf32>
    %9 = vector.extract_strided_slice %7 {offsets = [0, 0, 0], sizes = [8, 7, 4], strides = [1, 1, 1]} : vector<8x8x4xf32> to vector<8x7x4xf32>
    %10 = tpu.concatenate %8, %9 in 1 : vector<8x1x4xf32>, vector<8x7x4xf32> -> vector<8x8x4xf32>
    %11 = arith.maximumf %6, %10 : vector<8x8x4xf32>
    %12 = vector.extract_strided_slice %1 {offsets = [0, 1, 0, 0], sizes = [8, 1, 8, 8], strides = [1, 1, 1, 1]} : vector<8x2x8x8xf32> to vector<8x1x8x8xf32>
    %13 = vector.shape_cast %12 : vector<8x1x8x8xf32> to vector<8x8x8xf32>
    %14 = vector.extract_strided_slice %13 {offsets = [0, 0, 0], sizes = [8, 8, 4], strides = [1, 1, 1]} : vector<8x8x8xf32> to vector<8x8x4xf32>
    %15 = vector.extract_strided_slice %13 {offsets = [0, 0, 4], sizes = [8, 8, 4], strides = [1, 1, 1]} : vector<8x8x8xf32> to vector<8x8x4xf32>
    %16 = arith.maximumf %14, %15 : vector<8x8x4xf32>
    %17 = vector.extract_strided_slice %13 {offsets = [0, 0, 4], sizes = [8, 8, 4], strides = [1, 1, 1]} : vector<8x8x8xf32> to vector<8x8x4xf32>
    %cst_4 = arith.constant 0xFF800000 : f32
    %18 = vector.broadcast %cst_4 : f32 to vector<8x1x4xf32>
    %19 = vector.extract_strided_slice %17 {offsets = [0, 0, 0], sizes = [8, 7, 4], strides = [1, 1, 1]} : vector<8x8x4xf32> to vector<8x7x4xf32>
    %20 = tpu.concatenate %18, %19 in 1 : vector<8x1x4xf32>, vector<8x7x4xf32> -> vector<8x8x4xf32>
    %21 = arith.maximumf %16, %20 : vector<8x8x4xf32>
    %c0_5 = arith.constant 0 : index
    %c0_6 = arith.constant 0 : index
    %c0_7 = arith.constant 0 : index
    %c0_8 = arith.constant 0 : index
    %c0_9 = arith.constant 0 : index
    %22 = vector.load %arg3[%c0_5, %c0_6, %c0_7, %c0_8, %c0_9] : memref<1x1x1x8x8xf32, #tpu.memory_space<vmem>>, vector<1x1x1x8x8xf32>
    %23 = vector.shape_cast %22 : vector<1x1x1x8x8xf32> to vector<1x8x8xf32>
    %24 = vector.extract_strided_slice %23 {offsets = [0, 0, 0], sizes = [1, 8, 4], strides = [1, 1, 1]} : vector<1x8x8xf32> to vector<1x8x4xf32>
    %25 = vector.extract_strided_slice %23 {offsets = [0, 0, 4], sizes = [1, 8, 4], strides = [1, 1, 1]} : vector<1x8x8xf32> to vector<1x8x4xf32>
    %26 = arith.maximumf %24, %25 : vector<1x8x4xf32>
    %27 = vector.extract_strided_slice %23 {offsets = [0, 0, 4], sizes = [1, 8, 4], strides = [1, 1, 1]} : vector<1x8x8xf32> to vector<1x8x4xf32>
    %cst_10 = arith.constant 0xFF800000 : f32
    %28 = vector.broadcast %cst_10 : f32 to vector<1x1x4xf32>
    %29 = vector.extract_strided_slice %27 {offsets = [0, 0, 0], sizes = [1, 7, 4], strides = [1, 1, 1]} : vector<1x8x4xf32> to vector<1x7x4xf32>
    %30 = tpu.concatenate %28, %29 in 1 : vector<1x1x4xf32>, vector<1x7x4xf32> -> vector<1x8x4xf32>
    %31 = arith.maximumf %26, %30 : vector<1x8x4xf32>
    %c0_i32 = arith.constant 0 : i32
    %32 = arith.cmpi eq, %arg1, %c0_i32 : i32
    %cst_11 = arith.constant 0xFF800000 : f32
    %33 = vector.broadcast %cst_11 : f32 to vector<1x8x4xf32>
    %34 = arith.select %32, %33, %31 : vector<1x8x4xf32>
    %35 = vector.extract_strided_slice %21 {offsets = [0, 0, 0], sizes = [7, 8, 4], strides = [1, 1, 1]} : vector<8x8x4xf32> to vector<7x8x4xf32>
    %36 = tpu.concatenate %34, %35 in 0 : vector<1x8x4xf32>, vector<7x8x4xf32> -> vector<8x8x4xf32>
    %37 = arith.maximumf %11, %21 : vector<8x8x4xf32>
    %38 = arith.maximumf %37, %36 : vector<8x8x4xf32>
    %39 = vector.shape_cast %38 : vector<8x8x4xf32> to vector<8x32xf32>
    %c0_12 = arith.constant 0 : index
    %c0_13 = arith.constant 0 : index
    %c0_14 = arith.constant 0 : index
    %40 = vector.load %arg4[%c0_12, %c0_13, %c0_14] : memref<1x8x32xf32, #tpu.memory_space<vmem>>, vector<1x8x32xf32>
    %41 = vector.shape_cast %40 : vector<1x8x32xf32> to vector<8x32xf32>
    %42 = vector.shape_cast %39 : vector<8x32xf32> to vector<1x8x32xf32>
    tpu.vector_store %arg4[%c0_12, %c0_13, %c0_14], %42 {strides = array<i32>} : memref<1x8x32xf32, #tpu.memory_space<vmem>>, vector<1x8x32xf32>,
    return
  }
  func.func @transform_0(%arg0: i32, %arg1: i32) -> (i32, i32, i32, i32, i32) {
    %c0_i32 = arith.constant 0 : i32
    %c0_i32_0 = arith.constant 0 : i32
    %c0_i32_1 = arith.constant 0 : i32
    %c0_i32_2 = arith.constant 0 : i32
    return %arg0, %arg1, %c0_i32, %c0_i32_0, %c0_i32_1 : i32, i32, i32, i32, i32
  }
  func.func @transform_1(%arg0: i32, %arg1: i32) -> (i32, i32, i32, i32, i32) {
    %c8_i32 = arith.constant 8 : i32
    %0 = arith.muli %arg1, %c8_i32 : i32
    %c1_i32 = arith.constant 1 : i32
    %1 = arith.subi %0, %c1_i32 : i32
    %c0_i32 = arith.constant 0 : i32
    %2 = arith.maxsi %1, %c0_i32 : i32
    %c1_i32_0 = arith.constant 1 : i32
    %c0_i32_1 = arith.constant 0 : i32
    %c0_i32_2 = arith.constant 0 : i32
    %c0_i32_3 = arith.constant 0 : i32
    return %arg0, %2, %c1_i32_0, %c0_i32_1, %c0_i32_2 : i32, i32, i32, i32, i32
  }
  func.func @transform_2(%arg0: i32, %arg1: i32) -> (i32, i32, i32) {
    %c0_i32 = arith.constant 0 : i32
    %c0_i32_0 = arith.constant 0 : i32
    return %arg0, %arg1, %c0_i32 : i32, i32, i32
  }
}

</mosaic_0001>

<bundles_post_ra>
// kernel: tpu_custom_call.1
= control target key start
LH: loop header
LB: loop body
LE: loop exit
PB: predicated region body
PF: predicated region fallthrough
CT: control target
= control target key end

     0   :  { %7 = vsyncpa [#allocation3], 0  ;;  %s1442_s0 = inlined_call_operand.hbm [shape: f32[2,8,2,8,8], index: 0, kind: input, shape index: {}]   ;;  %s1443_s1 = inlined_call_operand.hbm [shape: f32[2,8,2,8,8], index: 1, kind: input, shape index: {}]   ;;  %s1444_s2 = inlined_call_operand.hbm [shape: f32[2,8,32], index: 2, kind: output, shape index: {}]  }
   0x1   :  { %9 = vsyncpa [#allocation3 + $0x1], 0 }
   0x2   :  { %10 = vsyncpa [#allocation6], 0 }
   0x3   :  { %12 = vsyncpa [#allocation6 + $0x1], 0 }
   0x4   :  { %13 = vsyncpa [#allocation4], 0 }
   0x5   :  { %15 = vsyncpa [#allocation4 + $0x1], 0  ;;  %s1049_s9 = smov 0   ;;  %s1051_s10 = smov 0  }
   0x6   :  { %s1053_s11 = smov 0   ;;  %s1055_s12 = smov 0  }
   0x7   :  { %s1057_s13 = smov 0   ;;  %s1059_s14 = smov 0  }
   0x8 LB: > { %s771_s15 = sadd.s32 4294967295, %s1017_s14   ;;  %s772_s16 = sadd.s32 4294967294, %s1017_s14   ;;  %s1017_s14 = sphi %s1059_s14, %s21_s14   ;;  %s1013_s13 = sphi %s1057_s13, %s1463_s13   ;;  %s1009_s12 = sphi %s1055_s12, %s1462_s12   ;;  %s1005_s11 = sphi %s1053_s11, %s1461_s11   ;;  %s1001_s10 = sphi %s1051_s10, %s1460_s10   ;;  %s997_s9 = sphi %s1049_s9, %s1459_s9  }
   0x9   : > { %s33_s17 = sadd.s32 1, %s1013_s13  ;;  %s42_s18 = sadd.s32 1, %s1005_s11 }
   0xa   : > { %p35_p0 = scmp.ge.s32.totalorder %s33_s17, 2  ;;  %p49_p1 = scmp.ne.s32.totalorder %s1005_s11, %s1001_s10 }
   0xb   : > { %p50_p2 = scmp.eq.s32.totalorder %s1017_s14, 0  ;;  %p55_p3 = scmp.ne.s32.totalorder %s1001_s10, %s997_s9 }
   0xc   : > { %s1465_s17 = smov (%p35_p0, %s33_s17), 0  ;;  %p56_p5 = scmp.eq.s32.totalorder %s771_s15, 0 }
   0xd   : > { %p1090_p4 = por %p50_p2, %p49_p1  ;;  %s37_s20 = ssub.s32 %s1013_s13, %s1465_s17 }
   0xe   : > { %p117_p6 = scmp.eq.s32.totalorder %s771_s15, 1  ;;  %p40_p7 = scmp.eq.s32.totalorder %s37_s20, 0 }
   0xf   : > { %p1096_p8 = por %p56_p5, %p55_p3  ;;  %p123_p10 = scmp.eq.s32.totalorder %s772_s16, 1 }
  0x10   : > { %p1100_p9 = por %p117_p6, %p49_p1  ;;  %p808_p13 = scmp.lt.s32.totalorder %s1017_s14, 2 }
  0x11   : > { %s1448_s21 = scalar_select %p1096_p8, 1, 0 }
  0x12   : > { %s1449_s22 = scalar_select %p1100_p9, 1, 0 }
  0x13   : > { %s1105_s23 = scalar_select %p40_p7, %s1005_s11, %s42_s18  }
  0x14   : > { %p1107_p11 = por %p123_p10, %p55_p3  ;;  %s1114_s25 = sand.u32 1, %s1005_s11  }
  0x15   : > { %s775_s26 = sshll.u32 %s1114_s25, 7  ;;  %s789_s27 = sshll.u32 %s1013_s13, 11 }
  0x16   : > { %s1450_s24 = scalar_select %p1107_p11, 1, 0 }
  0x17   : > { %s1123_s30 = scalar_lea.hbm %s1442_s0, %s789_s27  ;;  %s147_s3 = scalar_lea.vmem [#allocation2], %s775_s26 }
  0x18   : > { %s157_s4 = sshll.u32 %s147_s3, 4  ;;  %p1129_p0 = pnand %p808_p13, %p1090_p4  ;;  %s1125_s4 = int_to_ptr.vmem [resolvable:$true] %s157_s4 }
  0x19   : > { %s144_s6 = scalar_lea.sflag [#allocation3], %s1114_s25  ;;  %s870_s7 = scalar_lea.hbm %s1123_s30, 2048 }
  0x1a   : > { %p871_p2 = scmp.ne.s32.totalorder %s1123_s30, %s870_s7  ;;  %p872_p3 = pneg %p1129_p0 }
  0x1b   : > { %s875_s16 = scalar_lea.hbm %s1442_s0, 4096  ;;  %p876_p4 = scmp.lt.u32.totalorder %s1123_s30, %s1442_s0 }
  0x1c   : > { %p873_p5 = pnand %p872_p3, %p871_p2  ;;  %p877_p7 = scmp.lt.u32.totalorder %s875_s16, %s870_s7 }
  0x1d   : > { %p879_p13 = scmp.lt.u32.totalorder %s870_s7, %s1123_s30 }
  0x1e   : > { %p874_p6 = pneg %p873_p5  ;;  %p878_p10 = por %p877_p7, %p876_p4 }
  0x20   : > { %p880_p12 = por %p879_p13, %p878_p10 }
  0x22   : > { %p881_p1 = pnand %p880_p12, %p874_p6 }
  0x24   : > { %884 = shalt.err (!%p881_p1)
}
  0x25   : > { %s885_s20 = scalar_lea.vmem %s1125_s4, 2048  ;;  %s1019_s26 = smov [#allocation2]  }
  0x26   : > { %p886_p2 = scmp.ne.s32.totalorder %s1125_s4, %s885_s20  ;;  %s890_s28 = sshll.u32 %s1019_s26, 4  ;;  %s891_s28 = int_to_ptr.vmem [resolvable:$false] %s890_s28 }
  0x27   : > { %s892_s29 = scalar_lea.vmem %s891_s28, 4096  ;;  %p893_p9 = scmp.lt.s32.totalorder %s1125_s4, %s891_s28 }
  0x28   : > { %p888_p5 = pnand %p886_p2, %p872_p3  ;;  %p894_p4 = scmp.lt.s32.totalorder %s892_s29, %s885_s20 }
  0x2a   : > { %p889_p11 = pneg %p888_p5  ;;  %p895_p7 = por %p894_p4, %p893_p9 }
  0x2c   : > { %p896_p10 = pnand %p895_p7, %p889_p11 }
  0x2e   : > { %899 = shalt.err (!%p896_p10)
}
  0x2f   : > { %s1020_s3 = smov 128   ;;  %s1021_s7 = smov 8  }
  0x30   : > { %800 = dma.hbm_to_vmem [thread:$0]  (!%p1129_p0), %s1123_s30, 2048, %s1125_s4, %s144_s6, %s1020_s3, %s1020_s3, %s1021_s7  }
  0x31   : > { %p191_p12 = scmp.lt.s32.totalorder %s1017_s14, 3  ;;  %s778_s8 = sshll.u32 %s1114_s25, 3 }
  0x32   : > { %s704_s18 = scalar_lea.hbm %s1443_s1, %s789_s27  ;;  %p1452_p9 = scmp.ge.s32.totalorder %s1017_s14, 1 }
  0x33   : > { %s1175_s20 = scalar_lea.hbm %s704_s18, 128  ;;  %s171_s26 = scalar_lea.vmem [#allocation5], %s778_s8 }
  0x34   : > { %p1171_p11 = pnand %p1452_p9, %p191_p12  ;;  %s186_s28 = sshll.u32 %s171_s26, 4  ;;  %s187_s28 = int_to_ptr.vmem [resolvable:$true] %s186_s28 }
  0x35   : > { %s168_s30 = scalar_lea.sflag [#allocation6], %s1114_s25  ;;  %s930_s4 = scalar_lea.hbm %s704_s18, 256 }
  0x36   : > { %s1453_s19 = scalar_select %p1171_p11, 1, 0 }
  0x37   : > { %p901_p1 = scmp.ne.s32.totalorder %s1175_s20, %s930_s4  ;;  %s905_s29 = scalar_lea.hbm %s1443_s1, 4096 }
  0x38   : > { %p906_p2 = scmp.lt.u32.totalorder %s1175_s20, %s1443_s1  ;;  %p907_p5 = scmp.lt.u32.totalorder %s905_s29, %s930_s4 }
  0x39   : > { %p903_p6 = pnand %p901_p1, %p872_p3  ;;  %p909_p7 = scmp.lt.u32.totalorder %s930_s4, %s1175_s20 }
  0x3a   : > { %p908_p4 = por %p907_p5, %p906_p2 }
  0x3b   : > { %p904_p13 = pneg %p903_p6 }
  0x3c   : > { %p910_p10 = por %p909_p7, %p908_p4 }
  0x3e   : > { %p911_p12 = pnand %p910_p10, %p904_p13 }
  0x40   : > { %914 = shalt.err (!%p911_p12)
}
  0x41   : > { %s915_s25 = scalar_lea.vmem %s187_s28, 128  ;;  %s1022_s8 = smov [#allocation5]  }
  0x42   : > { %p916_p9 = scmp.ne.s32.totalorder %s187_s28, %s915_s25  ;;  %s920_s15 = sshll.u32 %s1022_s8, 4  ;;  %s921_s15 = int_to_ptr.vmem [resolvable:$false] %s920_s15 }
  0x43   : > { %s922_s16 = scalar_lea.vmem %s921_s15, 256  ;;  %p923_p8 = scmp.lt.s32.totalorder %s187_s28, %s921_s15 }
  0x44   : > { %p918_p1 = pnand %p916_p9, %p872_p3  ;;  %p924_p11 = scmp.lt.s32.totalorder %s922_s16, %s915_s25 }
  0x46   : > { %p919_p6 = pneg %p918_p1  ;;  %p925_p2 = por %p924_p11, %p923_p8 }
  0x48   : > { %p926_p5 = pnand %p925_p2, %p919_p6 }
  0x4a   : > { %929 = shalt.err (!%p926_p5)
}
  0x4b   : > { %803 = dma.hbm_to_vmem [thread:$0]  (!%p1129_p0), %s1175_s20, 128, %s187_s28, %s168_s30  }
  0x4c   : > { %p1454_p13 = scmp.ne.s32.totalorder %s1453_s19, 0 }
  0x4d   : > { %s1199_s18 = sand.u32 (!%p1454_p13), 1, %s1001_s10   ;;  %p1455_p8 = scmp.ne.s32.totalorder (!%p1454_p13), %s1448_s21, 0 }
  0x4e   : > { %195 = sbr.rel (%p1454_p13) target bundleno = 422 (0x1a6), region = 28  ;;  %s782_s26 = sshll.u32 (!%p1454_p13), %s1199_s18, 7 }
  0x4f   : > { %s198_s4 = scalar_lea.sflag (!%p1454_p13), [#allocation3], %s1199_s18  ;;  %s1203_s27 = scalar_lea.vmem (!%p1454_p13), [#allocation2], %s782_s26 }
  0x55   : > { %984 = dma.done.wait (%p1455_p8), %s198_s4, 2048  }
  0x56   : > { %986 = vsyncadd (%p1455_p8), %s198_s4, 4294965248  ;;  %s783_s5 = sshll.u32 %s1199_s18, 3  ;;  %s207_s19 = scalar_lea.sflag [#allocation6], %s1199_s18 }
  0x57   : > { %988 = dma.done.wait (%p1455_p8), %s207_s19, 128  }
  0x58   : > { %990 = vsyncadd (%p1455_p8), %s207_s19, 4294967168  ;;  %v1216_v0 = vld [vmem:[%s1203_s27 + $0x30] sm:$0xff]  ;;  %s1023_s20 = smov 124   ;;  %v1226_v2 = vld [vmem:[%s1203_s27 + $0x40] sm:$0xff]  ;;  %v1024_v54 = vmov 1983009808   ;;  %v472_v56 = vlaneseq }
  0x59   : > { %v1219_v1 = vld [vmem:[%s1203_s27 + $0x10] sm:$0xff]  ;;  %271 = vrot.lane.b32.xlu1 %v1216_v0, %s1023_s20  ;;  %v1229_v3 = vld [vmem:[%s1203_s27 + $0x20] sm:$0xff]  ;;  %v1246_v6 = vld [vmem:[%s1203_s27 + $0x18] sm:$0xff]  ;;  %v301_v16 = vrot.slane %v1226_v2, 7  ;;  %v300_v17 = vrot.slane %v1216_v0, 7  ;;  %v1339_v55 = vunpack.c.l.s4 %v1024_v54  ;;  %vm329_vm0 = vcmask 1040384  }
  0x5a   : > { %267 = vrot.lane.b32.xlu0 %v1219_v1, %s1023_s20  ;;  %v1236_v4 = vld [vmem:[%s1203_s27 + $0x60] sm:$0xff]  ;;  %v1239_v5 = vld [vmem:[%s1203_s27 + $0x50] sm:$0xff]  ;;  %v1256_v8 = vld [vmem:[%s1203_s27 + $0x38] sm:$0xff]  ;;  %v299_v14 = vrot.slane %v1229_v3, 7  ;;  %v298_v15 = vrot.slane %v1219_v1, 7  ;;  %v387_v20 = vrot.slane %v1246_v6, 7 }
  0x5b   : > { %v1249_v7 = vld [vmem:[%s1203_s27 + $0x70] sm:$0xff]  ;;  %v1259_v9 = vld [vmem:[%s1203_s27 + $0x28] sm:$0xff]  ;;  %v1266_v10 = vld [vmem:[%s1203_s27 + $0x58] sm:$0xff]  ;;  %v303_v18 = vrot.slane %v1236_v4, 7  ;;  %v302_v19 = vrot.slane %v1239_v5, 7  ;;  %v389_v22 = vrot.slane %v1256_v8, 7  ;;  %v471_v59 = vunpack.c.0.s8 %v1339_v55 }
  0x5c   : > { %v1269_v11 = vld [vmem:[%s1203_s27 + $0x48] sm:$0xff]  ;;  %v1276_v12 = vld [vmem:[%s1203_s27 + $0x78] sm:$0xff]  ;;  %v304_v21 = vrot.slane %v1249_v7, 7  ;;  %v388_v23 = vrot.slane %v1259_v9, 7  ;;  %v391_v24 = vrot.slane %v1266_v10, 7  ;;  %v1317_v29 = vld [vmem:[%s1203_s27] sm:$0xff] }
  0x5d   : > { %273 = vrot.lane.b32.xlu1 %v1226_v2, %s1023_s20  ;;  %v1279_v13 = vld [vmem:[%s1203_s27 + $0x68] sm:$0xff]  ;;  %v390_v25 = vrot.slane %v1269_v11, 7  ;;  %v393_v26 = vrot.slane %v1276_v12, 7  ;;  %v297_v31 = vrot.slane %v1317_v29, 7  ;;  %v1342_v60 = vshrl.u32 %v472_v56, 7  ;;  %s1026_s21 = smov 8  }
  0x5e   : > { %269 = vrot.lane.b32.xlu0 %v1229_v3, %s1023_s20  ;;  %v392_v27 = vrot.slane %v1279_v13, 7  ;;  %v1314_v28 = vld [vmem:[%s1203_s27 + $0x8] sm:$0xff]  ;;  %v1025_v61 = vmov 1934713408   ;;  %s1027_s28 = smov 4   ;;  %s1028_s30 = smov 16  }
  0x5f   : > { %v386_v30 = vrot.slane %v1314_v28, 7  ;;  %v1344_v62 = vunpack.c.l.s4 %v1025_v61  ;;  %s1029_s6 = smov 12   ;;  %s1030_s29 = smov 24   ;;  %vm631_vm1 = vcmask 31744   ;;  %vm633_vm2 = vcmask 64512  }
  0x60   : > { %s1031_s3 = smov 20   ;;  %s1032_s7 = smov 28   ;;  %vm635_vm3 = vcmask 97280   ;;  %vm637_vm4 = vcmask 130048   ;;  %vm639_vm5 = vcmask 162816   ;;  %vm641_vm6 = vcmask 195584  }
  0x61   : > { %277 = vrot.lane.b32.xlu1 %v1236_v4, %s1023_s20  ;;  %s786_s25 = sshll.u32 %s1009_s12, 7  ;;  %s235_s8 = scalar_lea.vmem [#allocation7], %s783_s5  ;;  %vm643_vm7 = vcmask 228352   ;;  %vm645_vm8 = vcmask 261120  }
  0x62   : > { %275 = vrot.lane.b32.xlu0 %v1239_v5, %s1023_s20  ;;  %s662_s15 = sshll.u32 %s235_s8, 4  ;;  %s1393_s4 = scalar_lea.hbm %s1444_s2, %s786_s25  ;;  %s1395_s15 = int_to_ptr.vmem [resolvable:$true] %s662_s15 }
  0x63   : > { %s648_s12 = scalar_lea.sflag [#allocation4], %s1199_s18  ;;  %s931_s27 = scalar_lea.vmem %s1395_s15, 128 }
  0x64   : > { %p932_p0 = scmp.ne.s32.totalorder %s1395_s15, %s931_s27  ;;  %p1456_p3 = scmp.ne.s32.totalorder %s1449_s22, 0 }
  0x65   : > { %356 = vrot.lane.b32.xlu1 %v1246_v6, %s1023_s20  ;;  %s1033_s5 = smov [#allocation7]  }
  0x66   : > { %279 = vrot.lane.b32.xlu0 %v1249_v7, %s1023_s20  ;;  %p933_p11 = pnand %p932_p0, %p1456_p3  ;;  %s935_s19 = sshll.u32 %s1033_s5, 4  ;;  %s936_s19 = int_to_ptr.vmem [resolvable:$false] %s935_s19 }
  0x67   : > { %p938_p7 = scmp.lt.s32.totalorder %s1395_s15, %s936_s19 }
  0x68   : > { %p934_p4 = pneg %p933_p11 }
  0x69   : > { %360 = vrot.lane.b32.xlu1 %v1256_v8, %s1023_s20 }
  0x6a   : > { %358 = vrot.lane.b32.xlu0 %v1259_v9, %s1023_s20 }
  0x6d   : > { %364 = vrot.lane.b32.xlu1 %v1266_v10, %s1023_s20 }
  0x6e   : > { %362 = vrot.lane.b32.xlu0 %v1269_v11, %s1023_s20 }
  0x71   : > { %368 = vrot.lane.b32.xlu1 %v1276_v12, %s1023_s20 }
  0x72   : > { %366 = vrot.lane.b32.xlu0 %v1279_v13, %s1023_s20 }
  0x75   : > { %309 = vrot.lane.b32.xlu1 %v299_v14, %s1023_s20 }
  0x76   : > { %307 = vrot.lane.b32.xlu0 %v298_v15, %s1023_s20 }
  0x79   : > { %313 = vrot.lane.b32.xlu1 %v301_v16, %s1023_s20 }
  0x7a   : > { %311 = vrot.lane.b32.xlu0 %v300_v17, %s1023_s20 }
  0x7d   : > { %317 = vrot.lane.b32.xlu1 %v303_v18, %s1023_s20 }
  0x7e   : > { %315 = vrot.lane.b32.xlu0 %v302_v19, %s1023_s20 }
  0x81   : > { %396 = vrot.lane.b32.xlu1 %v387_v20, %s1023_s20 }
  0x82   : > { %319 = vrot.lane.b32.xlu0 %v304_v21, %s1023_s20 }
  0x85   : > { %400 = vrot.lane.b32.xlu1 %v389_v22, %s1023_s20 }
  0x86   : > { %398 = vrot.lane.b32.xlu0 %v388_v23, %s1023_s20 }
  0x89   : > { %404 = vrot.lane.b32.xlu1 %v391_v24, %s1023_s20 }
  0x8a   : > { %402 = vrot.lane.b32.xlu0 %v390_v25, %s1023_s20 }
  0x8d   : > { %408 = vrot.lane.b32.xlu1 %v393_v26, %s1023_s20 }
  0x8e   : > { %406 = vrot.lane.b32.xlu0 %v392_v27, %s1023_s20 }
  0x91   : > { %354 = vrot.lane.b32.xlu1 %v1314_v28, %s1023_s20 }
  0x92   : > { %265 = vrot.lane.b32.xlu0 %v1317_v29, %s1023_s20 }
  0x95   : > { %394 = vrot.lane.b32.xlu1 %v386_v30, %s1023_s20 }
  0x96   : > { %305 = vrot.lane.b32.xlu0 %v297_v31, %s1023_s20  ;;  %s937_s20 = scalar_lea.vmem %s936_s19, 256 }
  0x97   : > { %p939_p10 = scmp.lt.s32.totalorder %s937_s20, %s931_s27 }
  0x99   : > { %p940_p12 = por %p939_p10, %p938_p7 }
  0x9b   : > { %p941_p9 = pnand %p940_p12, %p934_p4 }
  0xcb   : > { %v1327_v32 = vpop.permute.xlu1 %271 }
  0xcc   : > { %v1329_v33 = vpop.permute.xlu0 %267 }
  0xcf   : > { %v274_v34 = vpop.permute.xlu1 %273 }
  0xd0   : > { %v1331_v35 = vpop.permute.xlu0 %269  ;;  %v293_v63 = vmax.f32 %v1226_v2, %v274_v34 }
  0xd3   : > { %v278_v36 = vpop.permute.xlu1 %277 }
  0xd4   : > { %v276_v37 = vpop.permute.xlu0 %275  ;;  %v295_v14 = vmax.f32 %v1236_v4, %v278_v36 }
  0xd5   : > { %v294_v15 = vmax.f32 %v1239_v5, %v276_v37 }
  0xd7   : > { %v1333_v38 = vpop.permute.xlu1 %356 }
  0xd8   : > { %v280_v39 = vpop.permute.xlu0 %279 }
  0xd9   : > { %v296_v16 = vmax.f32 %v1249_v7, %v280_v39 }
  0xdb   : > { %v1335_v40 = vpop.permute.xlu1 %360 }
  0xdc   : > { %v1337_v41 = vpop.permute.xlu0 %358  ;;  %v381_v7 = vmax.f32 %v1256_v8, %v1335_v40 }
  0xdf   : > { %v365_v42 = vpop.permute.xlu1 %364 }
  0xe0   : > { %v363_v43 = vpop.permute.xlu0 %362  ;;  %v383_v17 = vmax.f32 %v1266_v10, %v365_v42  ;;  %v380_v10 = vmax.f32 %v1259_v9, %v1337_v41 }
  0xe1   : > { %v382_v18 = vmax.f32 %v1269_v11, %v363_v43 }
  0xe3   : > { %v369_v44 = vpop.permute.xlu1 %368 }
  0xe4   : > { %v367_v45 = vpop.permute.xlu0 %366  ;;  %v385_v25 = vmax.f32 %v1276_v12, %v369_v44 }
  0xe5   : > { %v384_v26 = vmax.f32 %v1279_v13, %v367_v45  ;;  %v292_v45 = vmax.f32 %v1216_v0, %v1327_v32 }
  0xe7   : > { %v310_v46 = vpop.permute.xlu1 %309 }
  0xe8   : > { %v308_v47 = vpop.permute.xlu0 %307  ;;  %v332_v27 = vsel %vm329_vm0, -inf, %v310_v46  ;;  %v291_v46 = vmax.f32 %v1229_v3, %v1331_v35 }
  0xea   : > { %v340_v0 = vmax.f32 %v291_v46, %v332_v27 }
  0xeb   : > { %v314_v48 = vpop.permute.xlu1 %313 }
  0xec   : > { %v312_v49 = vpop.permute.xlu0 %311  ;;  %v334_v19 = vsel %vm329_vm0, -inf, %v314_v48  ;;  %v331_v48 = vsel %vm329_vm0, -inf, %v308_v47 }
  0xed   : > { %v333_v30 = vsel %vm329_vm0, -inf, %v312_v49  ;;  %v342_v31 = vmax.f32 %v293_v63, %v334_v19 }
  0xee   : > { %v341_v32 = vmax.f32 %v292_v45, %v333_v30 }
  0xef   : > { %v318_v50 = vpop.permute.xlu1 %317 }
  0xf0   : > { %v316_v51 = vpop.permute.xlu0 %315  ;;  %v336_v20 = vsel %vm329_vm0, -inf, %v318_v50 }
  0xf1   : > { %v335_v23 = vsel %vm329_vm0, -inf, %v316_v51  ;;  %v344_v34 = vmax.f32 %v295_v14, %v336_v20  ;;  %v474_v14 = vsub.s32 %v471_v59, %v1342_v60 }
  0xf2   : > { %v343_v36 = vmax.f32 %v294_v15, %v335_v23 }
  0xf3   : > { %v397_v52 = vpop.permute.xlu1 %396 }
  0xf4   : > { %v320_v53 = vpop.permute.xlu0 %319  ;;  %v419_v49 = vsel %vm329_vm0, -inf, %v397_v52 }
  0xf5   : > { %v337_v2 = vsel %vm329_vm0, -inf, %v320_v53 }
  0xf6   : > { %v345_v37 = vmax.f32 %v296_v16, %v337_v2 }
  0xf7   : > { %v401_v57 = vpop.permute.xlu1 %400 }
  0xf8   : > { %v399_v58 = vpop.permute.xlu0 %398  ;;  %v421_v8 = vsel %vm329_vm0, -inf, %v401_v57  ;;  %v290_v57 = vmax.f32 %v1219_v1, %v1329_v33 }
  0xf9   : > { %v420_v9 = vsel %vm329_vm0, -inf, %v399_v58  ;;  %v429_v50 = vmax.f32 %v381_v7, %v421_v8  ;;  %v379_v58 = vmax.f32 %v1246_v6, %v1333_v38 }
  0xfa   : > { %v428_v51 = vmax.f32 %v380_v10, %v420_v9  ;;  %v339_v63 = vmax.f32 %v290_v57, %v331_v48 }
  0xfb   : > { %v405_v21 = vpop.permute.xlu1 %404  ;;  %v427_v52 = vmax.f32 %v379_v58, %v419_v49  ;;  %v454_v15 = vmax.f32 %v341_v32, %v429_v50 }
  0xfc   : > { %v403_v22 = vpop.permute.xlu0 %402  ;;  %v423_v4 = vsel %vm329_vm0, -inf, %v405_v21  ;;  %v453_v16 = vmax.f32 %v340_v0, %v428_v51  ;;  %v535_v21 = vunpack.c.0.s8 %v1344_v62 }
  0xfd   : > { %v422_v5 = vsel %vm329_vm0, -inf, %v403_v22  ;;  %v431_v11 = vmax.f32 %v383_v17, %v423_v4  ;;  %v452_v22 = vmax.f32 %v339_v63, %v427_v52 }
  0xfe   : > { %v430_v24 = vmax.f32 %v382_v18, %v422_v5  ;;  %v461_v10 = vmax.f32 %v453_v16, %v427_v52 }
  0xff   : > { %v409_v39 = vpop.permute.xlu1 %408  ;;  %v456_v41 = vmax.f32 %v343_v36, %v431_v11 }
 0x100   : > { %v407_v42 = vpop.permute.xlu0 %406  ;;  %v425_v40 = vsel %vm329_vm0, -inf, %v409_v39  ;;  %v455_v13 = vmax.f32 %v342_v31, %v430_v24 }
 0x101   : > { %v424_v12 = vsel %vm329_vm0, -inf, %v407_v42  ;;  %v433_v43 = vmax.f32 %v385_v25, %v425_v40  ;;  %v464_v3 = vmax.f32 %v456_v41, %v430_v24 }
 0x102   : > { %v432_v44 = vmax.f32 %v384_v26, %v424_v12  ;;  %v463_v61 = vmax.f32 %v455_v13, %v429_v50 }
 0x103   : > { %v458_v53 = vmax.f32 %v345_v37, %v433_v43  ;;  %v355_v55 = vpop.permute.xlu1 %354 }
 0x104   : > { %v457_v54 = vmax.f32 %v344_v34, %v432_v44  ;;  %v266_v56 = vpop.permute.xlu0 %265  ;;  %v378_v1 = vmax.f32 %v1314_v28, %v355_v55  ;;  %v538_v28 = vsub.s32 %v535_v21, %v1342_v60 }
 0x105   : > { %v466_v47 = vmax.f32 %v458_v53, %v432_v44  ;;  %v289_v6 = vmax.f32 %v1317_v29, %v266_v56 }
 0x106   : > { %v465_v35 = vmax.f32 %v457_v54, %v431_v11  ;;  %v462_v11 = vmax.f32 %v454_v15, %v428_v51 }
 0x107   : > { %v515_v18 = vcombine.low %v464_v3, %v466_v47  ;;  %v395_v19 = vpop.permute.xlu1 %394  ;;  %v516_v5 = vcombine.high %v464_v3, %v466_v47 }
 0x108   : > { %v499_v17 = vcombine.low %v463_v61, %v465_v35  ;;  %v306_v20 = vpop.permute.xlu0 %305  ;;  %v418_v33 = vsel %vm329_vm0, -inf, %v395_v19  ;;  %v500_v59 = vcombine.high %v463_v61, %v465_v35 }
 0x109   : > { %v330_v38 = vsel %vm329_vm0, -inf, %v306_v20  ;;  %v426_v23 = vmax.f32 %v378_v1, %v418_v33  ;;  %v523_v7 = vrot.slane %v515_v18, %v474_v14  ;;  %v530_v34 = vrot.slane %v516_v5, %v474_v14 }
 0x10a   : > { %v338_v2 = vmax.f32 %v289_v6, %v330_v38  ;;  %v507_v4 = vrot.slane %v499_v17, %v474_v14  ;;  %v514_v31 = vrot.slane %v500_v59, %v474_v14 }
 0x10b   : > { %v460_v24 = vmax.f32 %v452_v22, %v426_v23 }
 0x10c   : > { %v451_v25 = vmax.f32 %v338_v2, %v426_v23  ;;  %v564_v62 = vcombine.high %v507_v4, %v523_v7  ;;  %v563_v36 = vcombine.low %v507_v4, %v523_v7  ;;  %v579_v41 = vcombine.low %v514_v31, %v530_v34 }
 0x10d   : > { %v483_v29 = vcombine.low %v460_v24, %v462_v11  ;;  %v484_v26 = vcombine.high %v460_v24, %v462_v11  ;;  %v580_v53 = vcombine.high %v514_v31, %v530_v34 }
 0x10e   : > { %v467_v27 = vcombine.low %v451_v25, %v461_v10  ;;  %v468_v30 = vcombine.high %v451_v25, %v461_v10  ;;  %v578_v43 = vrot.slane %v564_v62, %v538_v28  ;;  %v571_v60 = vrot.slane %v563_v36, %v538_v28 }
 0x10f   : > { %v491_v37 = vrot.slane %v483_v29, %v474_v14  ;;  %v498_v39 = vrot.slane %v484_v26, %v474_v14  ;;  %v587_v51 = vrot.slane %v579_v41, %v538_v28  ;;  %v594_v57 = vrot.slane %v580_v53, %v538_v28 }
 0x110   : > { %v475_v42 = vrot.slane %v467_v27, %v474_v14  ;;  %v482_v8 = vrot.slane %v468_v30, %v474_v14 }
 0x112   : > { %v532_v9 = vcombine.high %v475_v42, %v491_v37  ;;  %v531_v40 = vcombine.low %v475_v42, %v491_v37  ;;  %v547_v12 = vcombine.low %v482_v8, %v498_v39  ;;  %v548_v49 = vcombine.high %v482_v8, %v498_v39 }
 0x114   : > { %v546_v13 = vrot.slane %v532_v9, %v538_v28  ;;  %v539_v44 = vrot.slane %v531_v40, %v538_v28  ;;  %v555_v48 = vrot.slane %v547_v12, %v538_v28  ;;  %v562_v56 = vrot.slane %v548_v49, %v538_v28 }
 0x116   : > { %v597_v45 = vcombine.low %v546_v13, %v578_v43  ;;  %v596_v46 = vcombine.high %v539_v44, %v571_v60  ;;  %v595_v50 = vcombine.low %v539_v44, %v571_v60  ;;  %v599_v54 = vcombine.low %v555_v48, %v587_v51 }
 0x117   : > { %v598_v55 = vcombine.high %v546_v13, %v578_v43  ;;  %v601_v58 = vcombine.low %v562_v56, %v594_v57  ;;  %v600_v0 = vcombine.high %v555_v48, %v587_v51  ;;  %v602_v32 = vcombine.high %v562_v56, %v594_v57 }
 0x118   : > { %608 = vrot.lane.b32.xlu1 %v597_v45, %s1026_s21  ;;  %604 = vrot.lane.b32.xlu0 %v596_v46, %s1027_s28 }
 0x11c   : > { %616 = vrot.lane.b32.xlu1 %v599_v54, %s1028_s30  ;;  %612 = vrot.lane.b32.xlu0 %v598_v55, %s1029_s6 }
 0x120   : > { %624 = vrot.lane.b32.xlu1 %v601_v58, %s1030_s29  ;;  %620 = vrot.lane.b32.xlu0 %v600_v0, %s1031_s3 }
 0x124   : > { %628 = vrot.lane.b32.xlu0 %v602_v32, %s1032_s7 }
 0x18a   : > { %v609_v61 = vpop.permute.xlu1 %608  ;;  %v605_v3 = vpop.permute.xlu0 %604 }
 0x18b   : > { %v632_v35 = vsel %vm631_vm1, %v595_v50, %v605_v3 }
 0x18c   : > { %v634_v52 = vsel %vm633_vm2, %v632_v35, %v609_v61 }
 0x18e   : > { %v617_v47 = vpop.permute.xlu1 %616  ;;  %v613_v63 = vpop.permute.xlu0 %612 }
 0x18f   : > { %v636_v14 = vsel %vm635_vm3, %v634_v52, %v613_v63 }
 0x190   : > { %v638_v16 = vsel %vm637_vm4, %v636_v14, %v617_v47 }
 0x192   : > { %v621_v15 = vpop.permute.xlu0 %620  ;;  %v625_v17 = vpop.permute.xlu1 %624 }
 0x193   : > { %v640_v18 = vsel %vm639_vm5, %v638_v16, %v621_v15 }
 0x194   : > { %v642_v20 = vsel %vm641_vm6, %v640_v18, %v625_v17 }
 0x196   : > { %v629_v19 = vpop.permute.xlu0 %628 }
 0x197   : > { %v644_v1 = vsel %vm643_vm7, %v642_v20, %v629_v19 }
 0x198   : > { %646 = vst.msk [vmem:[%s235_s8] sm:$0xff] %vm645_vm8, %v644_v1 }
 0x199   : > { %944 = shalt.err (!%p941_p9)
}
 0x19a   : > { %s945_s18 = scalar_lea.hbm %s1393_s4, 128  ;;  %s949_s30 = scalar_lea.hbm %s1444_s2, 256 }
 0x19b   : > { %p946_p1 = scmp.ne.s32.totalorder %s1393_s4, %s945_s18  ;;  %p950_p5 = scmp.lt.u32.totalorder %s1393_s4, %s1444_s2 }
 0x19c   : > { %p951_p13 = scmp.lt.u32.totalorder %s949_s30, %s945_s18  ;;  %p953_p0 = scmp.lt.u32.totalorder %s945_s18, %s1393_s4 }
 0x19d   : > { %p947_p6 = pnand %p946_p1, %p1456_p3 }
 0x19e   : > { %p952_p8 = por %p951_p13, %p950_p5 }
 0x19f   : > { %p948_p2 = pneg %p947_p6 }
 0x1a0   : > { %p954_p11 = por %p953_p0, %p952_p8 }
 0x1a2   : > { %p955_p4 = pnand %p954_p11, %p948_p2 }
 0x1a4   : > { %958 = shalt.err (!%p955_p4)
}
 0x1a5   : > { %795 = dma.vmem_to_hbm [thread:$0]  (%p1456_p3), %s1395_s15, 128, %s1393_s4, %s648_s12  }
 0x1a6 PF: > { %s674_s3 = sand.u32 1, %s997_s9   ;;  %p1457_p7 = scmp.ne.s32.totalorder %s1450_s24, 0 }
 0x1a7   : > { %p1458_p10 = scmp.ge.s32.totalorder %s1017_s14, 2  ;;  %s675_s7 = scalar_lea.sflag [#allocation4], %s674_s3 }
 0x1a9   : > { %p805_p12 = pnand %p1458_p10, %p1457_p7 }
 0x1ab   : > { %992 = dma.done.wait (!%p805_p12), %s675_s7, 128  }
 0x1ac   : > { %994 = vsyncadd (!%p805_p12), %s675_s7, 4294967168  ;;  %s21_s14 = sadd.s32 1, %s1017_s14   ;;  %s1459_s9 = smov %s1001_s10 }
 0x1ad   : > { %p18_p9 = scmp.ge.s32.totalorder %s21_s14, 4   ;;  %s1460_s10 = smov %s1005_s11 }
 0x1ae   : > { %s1461_s11 = smov %s1105_s23  ;;  %s1462_s12 = smov %s1013_s13 }
 0x1af   : > { %s1463_s13 = smov %s1465_s17  ;;  %20 = sbr.rel (!%p18_p9) target bundleno = 8 (0x8), region = 86 }
 0x1b6   :  { %680 = vsyncpa [#allocation3], 1 }
 0x1b7   :  { %682 = vsyncpa [#allocation3 + $0x1], 1 }
 0x1b8   :  { %683 = vsyncpa [#allocation6], 1 }
 0x1b9   :  { %685 = vsyncpa [#allocation6 + $0x1], 1 }
 0x1ba   :  { %686 = vsyncpa [#allocation4], 1 }
 0x1bb   :  { %688 = vsyncpa [#allocation4 + $0x1], 1 }

</bundles_post_ra>
